<compile_context>
chip_gen: v5e
topology: v5e:2x2
jax: 0.10.0
libtpu: 0.0.40
codegen_flags: <defaults>
</compile_context>

<pallas_src>
import functools

import jax
import jax.numpy as jnp
from jax import lax
from jax.experimental import pallas as pl
from jax.experimental.pallas import tpu as pltpu

PACK = 4  # pixels packed per 128-lane row (4 * 32 channels = 128 lanes)


# ---------------------------------------------------------------------------
# helpers
# ---------------------------------------------------------------------------
def cdiv(a, b):
    return -(-a // b)


def round_up(a, b):
    return cdiv(a, b) * b


# ---------------------------------------------------------------------------
# Kernel: fused EAG, 4 pixels packed per row (all tensors 128-lane dense).
#   g1  = relu(g_bf16 @ Wg_pack + cg)          (grouped 1x1 conv + BN folded)
#   x1  = relu(x_bf16 @ Wx_pack + cx)
#   psi = sigmoid((g1+x1)_bf16 @ Mpsi_pack + c_psi)   # per-pixel value already
#                                                      # replicated over lanes
#   out = x * (psi + 1)                                # f32 store
# ---------------------------------------------------------------------------
def eag_kernel(g_ref, x_ref, wg_ref, wx_ref, cg_ref, cx_ref, mpsi_ref,
               cpsi_ref, o_ref):
    g = g_ref[...]                                    # (TM, PACK*F_g)  bf16
    x = x_ref[...]                                    # (TM, PACK*F_l)  bf16
    # bf16 MXU inputs, f32 accumulation.
    g1 = jnp.maximum(
        jnp.dot(g, wg_ref[...], preferred_element_type=jnp.float32)
        + cg_ref[...], 0.0)
    x1 = jnp.maximum(
        jnp.dot(x, wx_ref[...], preferred_element_type=jnp.float32)
        + cx_ref[...], 0.0)
    # Both operands are already ReLU'd, so the module's outer ReLU is a no-op.
    h = g1 + x1                                       # (TM, PACK*F_int) f32
    # psi reduce + per-pixel lane broadcast as one MXU matmul (each (p,p) block
    # of Mpsi has every column equal to w_psi), so no cross-lane VPU/XLU work.
    # NOTE: h is double-rounded (f32 accumulate -> bf16 -> matmul); this is
    # intentional, mirrored by eag_ref_matched, and covered by the documented
    # tolerance vs the exact f32 reference.
    psi = jax.nn.sigmoid(
        jnp.dot(h.astype(jnp.bfloat16), mpsi_ref[...],
                preferred_element_type=jnp.float32) + cpsi_ref[...])
    # skip path: out = x*psi + x == x*(psi+1); bf16 x promoted to f32.
    o_ref[...] = x.astype(jnp.float32) * (psi + 1.0)  # 128-lane unmasked store


# ---------------------------------------------------------------------------
# Parameter construction / folding / packing (glue, plain JAX)
# ---------------------------------------------------------------------------
def grouped_dense(w, groups, cin, cout):
    """Materialize a grouped 1x1 conv weight (cout, cin//groups) as a dense
    block-diagonal (cin, cout) matrix (PyTorch grouped-conv semantics)."""
    cig, cog = cin // groups, cout // groups
    dense = jnp.zeros((cin, cout), jnp.float32)
    for g in range(groups):
        blk = w[g * cog:(g + 1) * cog, :]             # (cog, cig)
        dense = dense.at[g * cig:(g + 1) * cig,
                         g * cog:(g + 1) * cog].set(blk.T)
    return dense


def init_eag_params(key, F_g, F_l, F_int, num_groups=32):
    keys = iter(jax.random.split(key, 24))

    def u(shape, lo=-0.5, hi=0.5):
        return jax.random.uniform(next(keys), shape, jnp.float32, lo, hi)

    p = {}
    p['wg'] = u((F_int, F_g // num_groups))   # grouped conv g weight (1x1 flat)
    p['bg'] = u((F_int,))
    p['wx'] = u((F_int, F_l // num_groups))   # grouped conv x weight
    p['bx'] = u((F_int,))
    for name in ('g', 'x'):
        p[f'bn_{name}_gamma'] = u((F_int,), 0.5, 1.5)
        p[f'bn_{name}_beta'] = u((F_int,), -0.2, 0.2)
        p[f'bn_{name}_mean'] = u((F_int,), -0.2, 0.2)
        p[f'bn_{name}_var'] = u((F_int,), 0.5, 1.5)
    p['w_psi'] = u((F_int,))                  # psi conv (1, F_int, 1, 1) flat
    p['b_psi'] = u(())
    p['bn_psi_gamma'] = u((), 0.5, 1.5)
    p['bn_psi_beta'] = u((), -0.2, 0.2)
    p['bn_psi_mean'] = u((), -0.2, 0.2)
    p['bn_psi_var'] = u((), 0.5, 1.5)
    return p


def fold_eag_params(p, F_g, F_l, F_int, num_groups, eps=1e-5):
    """Fold eval-mode BN into the 1x1 conv weights / biases."""
    wg_d = grouped_dense(p['wg'], num_groups, F_g, F_int)      # (F_g, F_int)
    wx_d = grouped_dense(p['wx'], num_groups, F_l, F_int)      # (F_l, F_int)
    sg = p['bn_g_gamma'] / jnp.sqrt(p['bn_g_var'] + eps)
    tg = p['bn_g_beta'] - p['bn_g_mean'] * sg
    sx = p['bn_x_gamma'] / jnp.sqrt(p['bn_x_var'] + eps)
    tx = p['bn_x_beta'] - p['bn_x_mean'] * sx
    wg_eff = wg_d * sg[None, :]
    cg = p['bg'] * sg + tg
    wx_eff = wx_d * sx[None, :]
    cx = p['bx'] * sx + tx
    s_psi = p['bn_psi_gamma'] / jnp.sqrt(p['bn_psi_var'] + eps)
    t_psi = p['bn_psi_beta'] - p['bn_psi_mean'] * s_psi
    wpsi_eff = p['w_psi'] * s_psi
    c_psi = p['b_psi'] * s_psi + t_psi
    return wg_eff, wx_eff, cg, cx, wpsi_eff, c_psi


def pack_eag_params(wg_eff, wx_eff, cg, cx, wpsi_eff, c_psi, pack,
                    F_g, F_l, F_int):
    """Replicate folded weights block-diagonally for PACK pixels per row."""
    eye = jnp.eye(pack, dtype=jnp.float32)
    wg_p = jnp.kron(eye, wg_eff)                           # (P*F_g,  P*F_int)
    wx_p = jnp.kron(eye, wx_eff)                           # (P*F_l,  P*F_int)
    psi_blk = jnp.broadcast_to(wpsi_eff[:, None], (F_int, F_l))
    mpsi_p = jnp.kron(eye, psi_blk)                        # (P*F_int, P*F_l)
    cg_p = jnp.tile(cg, pack)[None, :]                     # (1, P*F_int)
    cx_p = jnp.tile(cx, pack)[None, :]
    cpsi_p = jnp.full((1, pack * F_l), c_psi, jnp.float32)
    return (wg_p.astype(jnp.bfloat16), wx_p.astype(jnp.bfloat16),
            cg_p, cx_p, mpsi_p.astype(jnp.bfloat16), cpsi_p)


def eag_prepare_params(params, F_g, F_l, F_int, num_groups, pack=PACK):
    folded = fold_eag_params(params, F_g, F_l, F_int, num_groups)
    return pack_eag_params(*folded, pack, F_g, F_l, F_int)


# ---------------------------------------------------------------------------
# Tiling / VMEM policy
# ---------------------------------------------------------------------------
def _default_tm_target():
    """Per-generation row-tile target (rows = PACK pixels each)."""
    try:
        kind = jax.devices()[0].device_kind.lower()
    except Exception:
        return 4096
    if "v5" in kind or "v6" in kind:
        return 8192   # 128 MiB VMEM -> big tiles, per-step overhead amortized
    return 4096       # v7x (64 MiB VMEM) and unknown chips: conservative


def _vmem_budget_bytes(tm, wg, wl, wi):
    """Re-derived VMEM budget: double-buffered I/O + whole-tile intermediates
    (g1, x1, h_bf16, psi, out temp) + resident packed weights + headroom."""
    io = 2 * tm * (2 * wg + 2 * wl + 4 * wl)                  # bf16 in, f32 out
    tmp = tm * (4 * wi + 4 * wi + 2 * wi + 4 * wl + 4 * wl)
    wts = 2 * (wg * wi + wl * wi + wi * wl) + 4 * (2 * wi + wl)
    return io + tmp + wts + (4 << 20)


# ---------------------------------------------------------------------------
# Pallas-backed forward
# ---------------------------------------------------------------------------
def eag_forward_pallas_nhwc(g_nhwc, x_nhwc, packed, F_g, F_l, F_int,
                            pack=PACK, tm_target=None):
    """NHWC-native path (no layout transposes): preferred entry point."""
    wg_p, wx_p, cg_p, cx_p, mpsi_p, cpsi_p = packed
    B, H, W, Cg = g_nhwc.shape
    Bx, Hx, Wx, Cl = x_nhwc.shape
    assert (B, H, W) == (Bx, Hx, Wx) and Cg == F_g and Cl == F_l
    npix = B * H * W

    # bf16 cast fused by XLA into the reshape/transpose copy that feeds this
    # function -> input HBM traffic halves (kernel is memory-bound everywhere).
    g2 = g_nhwc.reshape(npix, F_g).astype(jnp.bfloat16)
    x2 = x_nhwc.reshape(npix, F_l).astype(jnp.bfloat16)

    # Pad only to a multiple of PACK*8 pixels (usually a no-op). Ragged last
    # row-tiles are handled by a cdiv grid; no pad-to-tile-multiple copy.
    npix_pad = round_up(npix, pack * 8)
    if npix_pad != npix:  # zero pixels -> x=0 -> out rows 0, sliced off below
        g2 = jnp.pad(g2, ((0, npix_pad - npix), (0, 0)))
        x2 = jnp.pad(x2, ((0, npix_pad - npix), (0, 0)))

    WG, WL, WI = pack * F_g, pack * F_l, pack * F_int
    rows = npix_pad // pack
    gp = g2.reshape(rows, WG)
    xp = x2.reshape(rows, WL)

    if tm_target is None:
        tm_target = _default_tm_target()
    # Keep tiles large but ensure >= 2 grid blocks whenever rows allow, so both
    # v7x TensorCores get work under dimension_semantics=("parallel",).
    tm = max(8, min(tm_target, round_up(cdiv(rows, 2), 8)))
    grid = (cdiv(rows, tm),)

    vmem_bytes = int(min(max(32 << 20, _vmem_budget_bytes(tm, WG, WL, WI)),
                         100 << 20))

    cost = pl.CostEstimate(
        flops=int(2 * rows * (WG * WI + WL * WI + WI * WL)),
        # WL sigmoids/row are issued (only PACK unique values); advisory only.
        transcendentals=int(rows * WL),
        bytes_accessed=int(2 * (gp.size + xp.size)          # bf16 inputs
                           + 4 * rows * WL                   # f32 output
                           + 2 * (wg_p.size + wx_p.size + mpsi_p.size)
                           + 4 * (cg_p.size + cx_p.size + cpsi_p.size)),
    )

    out = pl.pallas_call(
        eag_kernel,
        out_shape=jax.ShapeDtypeStruct((rows, WL), jnp.float32),
        grid_spec=pltpu.PrefetchScalarGridSpec(
            num_scalar_prefetch=0,
            grid=grid,
            in_specs=[
                pl.BlockSpec((tm, WG), lambda i: (i, 0)),    # g pixels (bf16)
                pl.BlockSpec((tm, WL), lambda i: (i, 0)),    # x pixels (bf16)
                # Constant-index weight/bias blocks: block index never changes
                # across grid steps, so they are not re-DMA'd per step.
                pl.BlockSpec((WG, WI), lambda i: (0, 0)),    # Wg packed (bf16)
                pl.BlockSpec((WL, WI), lambda i: (0, 0)),    # Wx packed (bf16)
                pl.BlockSpec((1, WI), lambda i: (0, 0)),     # cg (f32)
                pl.BlockSpec((1, WI), lambda i: (0, 0)),     # cx (f32)
                pl.BlockSpec((WI, WL), lambda i: (0, 0)),    # Mpsi packed (bf16)
                pl.BlockSpec((1, WL), lambda i: (0, 0)),     # c_psi (f32)
            ],
            out_specs=pl.BlockSpec((tm, WL), lambda i: (i, 0)),
        ),
        compiler_params=pltpu.CompilerParams(
            dimension_semantics=("parallel",),
            vmem_limit_bytes=vmem_bytes,
        ),
        cost_estimate=cost,
    )(gp, xp, wg_p, wx_p, cg_p, cx_p, mpsi_p, cpsi_p)

    return out.reshape(npix_pad, F_l)[:npix].reshape(B, H, W, F_l)


def eag_forward_pallas(g_nchw, x_nchw, params, F_g, F_l, F_int,
                       num_groups=32, pack=PACK, tm_target=None):
    """NCHW wrapper matching the PyTorch interface.  The NCHW<->NHWC transposes
    here are layout plumbing that costs more HBM traffic than the kernel; keep
    activations NHWC end-to-end and call eag_forward_pallas_nhwc to avoid them."""
    B, Cg, H, W = g_nchw.shape
    Bx, Cl, Hx, Wx = x_nchw.shape
    assert (B, H, W) == (Bx, Hx, Wx) and Cg == F_g and Cl == F_l
    packed = eag_prepare_params(params, F_g, F_l, F_int, num_groups, pack)
    g_nhwc = jnp.transpose(g_nchw, (0, 2, 3, 1))   # cast fused downstream
    x_nhwc = jnp.transpose(x_nchw, (0, 2, 3, 1))
    out = eag_forward_pallas_nhwc(g_nhwc, x_nhwc, packed, F_g, F_l, F_int,
                                  pack, tm_target)
    return jnp.transpose(out, (0, 3, 1, 2))        # back to NCHW


# ---------------------------------------------------------------------------
# Pure-JAX references
# ---------------------------------------------------------------------------
def eag_ref_exact(g_nchw, x_nchw, p, F_g, F_l, F_int, num_groups=32, eps=1e-5):
    """Full-f32 (HIGHEST) reference of the module's eval-mode math."""
    g = jnp.transpose(g_nchw, (0, 2, 3, 1))
    x = jnp.transpose(x_nchw, (0, 2, 3, 1))

    def bn(v, ga, be, me, va):
        return (v - me) / jnp.sqrt(va + eps) * ga + be

    hi = lax.Precision.HIGHEST
    wg = grouped_dense(p['wg'], num_groups, F_g, F_int)
    wx = grouped_dense(p['wx'], num_groups, F_l, F_int)
    g1 = jax.nn.relu(bn(jnp.einsum('bhwc,cd->bhwd', g, wg, precision=hi)
                        + p['bg'], p['bn_g_gamma'], p['bn_g_beta'],
                        p['bn_g_mean'], p['bn_g_var']))
    x1 = jax.nn.relu(bn(jnp.einsum('bhwc,cd->bhwd', x, wx, precision=hi)
                        + p['bx'], p['bn_x_gamma'], p['bn_x_beta'],
                        p['bn_x_mean'], p['bn_x_var']))
    h = jax.nn.relu(g1 + x1)
    psi_lin = jnp.einsum('bhwd,d->bhw', h, p['w_psi'], precision=hi) + p['b_psi']
    psi = jax.nn.sigmoid(bn(psi_lin, p['bn_psi_gamma'], p['bn_psi_beta'],
                            p['bn_psi_mean'], p['bn_psi_var']))[..., None]
    out = x * psi + x
    return jnp.transpose(out, (0, 3, 1, 2))


def eag_ref_matched(g_nchw, x_nchw, p, F_g, F_l, F_int, num_groups=32):
    """Same math with folded weights and bf16-rounded g/x/h operands -- mirrors
    the kernel numerics (validates packing/folding/BlockSpec wiring tightly)."""
    wg_eff, wx_eff, cg, cx, wpsi_eff, c_psi = fold_eag_params(
        p, F_g, F_l, F_int, num_groups)
    B, _, H, W = g_nchw.shape
    g = jnp.transpose(g_nchw, (0, 2, 3, 1)).reshape(-1, F_g)
    x = jnp.transpose(x_nchw, (0, 2, 3, 1)).reshape(-1, F_l)
    rnd = lambda a: a.astype(jnp.bfloat16).astype(jnp.float32)
    hi = lax.Precision.HIGHEST
    g1 = jax.nn.relu(jnp.dot(rnd(g), rnd(wg_eff), precision=hi) + cg)
    x1 = jax.nn.relu(jnp.dot(rnd(x), rnd(wx_eff), precision=hi) + cx)
    h = g1 + x1
    psi = jax.nn.sigmoid(
        jnp.dot(rnd(h), rnd(wpsi_eff)[:, None], precision=hi) + c_psi)
    out = rnd(x) * (psi + 1.0)                     # bf16 x skip path, like kernel
    return jnp.transpose(out.reshape(B, H, W, F_l), (0, 3, 1, 2))


# ---------------------------------------------------------------------------
if __name__ == "__main__":
    F_g = F_l = F_int = 32            # num_groups=32 requires divisibility
    num_groups = 32
    B, H, W = 2, 16, 16

    key = jax.random.PRNGKey(0)
    kg, kx, kp = jax.random.split(key, 3)
    g = jax.random.normal(kg, (B, F_g, H, W), jnp.float32)      # NCHW
    x = jax.random.normal(kx, (B, F_l, H, W), jnp.float32)      # NCHW
    params = init_eag_params(kp, F_g, F_l, F_int, num_groups)

    fwd = jax.jit(functools.partial(eag_forward_pallas, F_g=F_g, F_l=F_l,
                                    F_int=F_int, num_groups=num_groups))
    out = jax.block_until_ready(fwd(g, x, params))
    assert out.shape == (B, F_l, H, W), out.shape

    # Tight check vs the matched-precision reference (same bf16 numerics).
    err_m = float(jnp.max(jnp.abs(out - eag_ref_matched(
        g, x, params, F_g, F_l, F_int, num_groups))))
    # Sanity check vs the exact f32 reference.  Tolerance (2e-1 abs) covers the
    # bf16 MXU rounding of g/x/h plus the bf16 skip-path x adopted per the
    # performance review (sigmoid gating amplified by |x|).
    err_e = float(jnp.max(jnp.abs(out - eag_ref_exact(
        g, x, params, F_g, F_l, F_int, num_groups))))

    ok = (err_m == err_m) and (err_e == err_e)      # NaN checks
    ok = ok and err_m < 2e-2 and err_e < 2e-1
    if not ok:
        raise SystemExit(f"mismatch vs reference: matched={err_m} exact={err_e}")

    print("KERNEL_OK")
</pallas_src>

<mosaic_0001>
module attributes {stable_mosaic.version = 11 : i64} {
  func.func @eag_kernel(%arg0: i32, %arg1: memref<64x128xbf16, #tpu.memory_space<vmem>>, %arg2: memref<64x128xbf16, #tpu.memory_space<vmem>>, %arg3: memref<128x128xbf16, #tpu.memory_space<vmem>>, %arg4: memref<128x128xbf16, #tpu.memory_space<vmem>>, %arg5: memref<1x128xf32, #tpu.memory_space<vmem>>, %arg6: memref<1x128xf32, #tpu.memory_space<vmem>>, %arg7: memref<128x128xbf16, #tpu.memory_space<vmem>>, %arg8: memref<1x128xf32, #tpu.memory_space<vmem>>, %arg9: memref<64x128xf32, #tpu.memory_space<vmem>>) attributes {dimension_semantics = [#tpu.dimension_semantics<parallel>], iteration_bounds = array<i64: 2>, scalar_prefetch = 0 : i64, scratch_operands = 0 : i64, tpu.core_type = #tpu.core_type<tc>, window_params = [{transform_indices = @transform_0, window_bounds = array<i64: 64, 128>}, {transform_indices = @transform_1, window_bounds = array<i64: 64, 128>}, {pipeline_mode = #tpu.pipeline_mode<synchronous>, transform_indices = @transform_2, window_bounds = array<i64: 128, 128>}, {pipeline_mode = #tpu.pipeline_mode<synchronous>, transform_indices = @transform_3, window_bounds = array<i64: 128, 128>}, {pipeline_mode = #tpu.pipeline_mode<synchronous>, transform_indices = @transform_4, window_bounds = array<i64: 1, 128>}, {pipeline_mode = #tpu.pipeline_mode<synchronous>, transform_indices = @transform_5, window_bounds = array<i64: 1, 128>}, {pipeline_mode = #tpu.pipeline_mode<synchronous>, transform_indices = @transform_6, window_bounds = array<i64: 128, 128>}, {pipeline_mode = #tpu.pipeline_mode<synchronous>, transform_indices = @transform_7, window_bounds = array<i64: 1, 128>}, {transform_indices = @transform_8, window_bounds = array<i64: 64, 128>}]} {
    %c0 = arith.constant 0 : index
    %c0_0 = arith.constant 0 : index
    %0 = vector.load %arg1[%c0, %c0_0] : memref<64x128xbf16, #tpu.memory_space<vmem>>, vector<64x128xbf16>
    %c0_1 = arith.constant 0 : index
    %c0_2 = arith.constant 0 : index
    %1 = vector.load %arg2[%c0_1, %c0_2] : memref<64x128xbf16, #tpu.memory_space<vmem>>, vector<64x128xbf16>
    %c0_3 = arith.constant 0 : index
    %c0_4 = arith.constant 0 : index
    %2 = vector.load %arg3[%c0_3, %c0_4] : memref<128x128xbf16, #tpu.memory_space<vmem>>, vector<128x128xbf16>
    %cst = arith.constant dense<0.000000e+00> : vector<64x128xf32>
    %3 = tpu.matmul %0, %2, %cst {dimension_numbers = #tpu.dot_dimension_numbers<[1], [0], [0], [1], [0, 0, 1, 1], [], []>} : vector<64x128xbf16>, vector<128x128xbf16>, vector<64x128xf32> -> vector<64x128xf32>
    %c0_5 = arith.constant 0 : index
    %c0_6 = arith.constant 0 : index
    %4 = vector.load %arg5[%c0_5, %c0_6] : memref<1x128xf32, #tpu.memory_space<vmem>>, vector<1x128xf32>
    %5 = vector.broadcast %4 : vector<1x128xf32> to vector<64x128xf32>
    %6 = arith.addf %3, %5 : vector<64x128xf32>
    %cst_7 = arith.constant 0.000000e+00 : f32
    %7 = vector.broadcast %cst_7 : f32 to vector<64x128xf32>
    %8 = arith.maximumf %6, %7 : vector<64x128xf32>
    %c0_8 = arith.constant 0 : index
    %c0_9 = arith.constant 0 : index
    %9 = vector.load %arg4[%c0_8, %c0_9] : memref<128x128xbf16, #tpu.memory_space<vmem>>, vector<128x128xbf16>
    %cst_10 = arith.constant dense<0.000000e+00> : vector<64x128xf32>
    %10 = tpu.matmul %1, %9, %cst_10 {dimension_numbers = #tpu.dot_dimension_numbers<[1], [0], [0], [1], [0, 0, 1, 1], [], []>} : vector<64x128xbf16>, vector<128x128xbf16>, vector<64x128xf32> -> vector<64x128xf32>
    %c0_11 = arith.constant 0 : index
    %c0_12 = arith.constant 0 : index
    %11 = vector.load %arg6[%c0_11, %c0_12] : memref<1x128xf32, #tpu.memory_space<vmem>>, vector<1x128xf32>
    %12 = vector.broadcast %11 : vector<1x128xf32> to vector<64x128xf32>
    %13 = arith.addf %10, %12 : vector<64x128xf32>
    %cst_13 = arith.constant 0.000000e+00 : f32
    %14 = vector.broadcast %cst_13 : f32 to vector<64x128xf32>
    %15 = arith.maximumf %13, %14 : vector<64x128xf32>
    %16 = arith.addf %8, %15 : vector<64x128xf32>
    %17 = arith.truncf %16 : vector<64x128xf32> to vector<64x128xbf16>
    %c0_14 = arith.constant 0 : index
    %c0_15 = arith.constant 0 : index
    %18 = vector.load %arg7[%c0_14, %c0_15] : memref<128x128xbf16, #tpu.memory_space<vmem>>, vector<128x128xbf16>
    %cst_16 = arith.constant dense<0.000000e+00> : vector<64x128xf32>
    %19 = tpu.matmul %17, %18, %cst_16 {dimension_numbers = #tpu.dot_dimension_numbers<[1], [0], [0], [1], [0, 0, 1, 1], [], []>} : vector<64x128xbf16>, vector<128x128xbf16>, vector<64x128xf32> -> vector<64x128xf32>
    %c0_17 = arith.constant 0 : index
    %c0_18 = arith.constant 0 : index
    %20 = vector.load %arg8[%c0_17, %c0_18] : memref<1x128xf32, #tpu.memory_space<vmem>>, vector<1x128xf32>
    %21 = vector.broadcast %20 : vector<1x128xf32> to vector<64x128xf32>
    %22 = arith.addf %19, %21 : vector<64x128xf32>
    %23 = arith.negf %22 : vector<64x128xf32>
    %24 = math.exp %23 : vector<64x128xf32>
    %cst_19 = arith.constant 1.000000e+00 : f32
    %25 = vector.broadcast %cst_19 : f32 to vector<64x128xf32>
    %26 = arith.addf %25, %24 : vector<64x128xf32>
    %27 = arith.divf %25, %26 : vector<64x128xf32>
    %28 = arith.extf %1 : vector<64x128xbf16> to vector<64x128xf32>
    %cst_20 = arith.constant 1.000000e+00 : f32
    %29 = vector.broadcast %cst_20 : f32 to vector<64x128xf32>
    %30 = arith.addf %27, %29 : vector<64x128xf32>
    %31 = arith.mulf %28, %30 : vector<64x128xf32>
    %c0_21 = arith.constant 0 : index
    %c0_22 = arith.constant 0 : index
    %32 = vector.load %arg9[%c0_21, %c0_22] : memref<64x128xf32, #tpu.memory_space<vmem>>, vector<64x128xf32>
    tpu.vector_store %arg9[%c0_21, %c0_22], %31 {strides = array<i32>} : memref<64x128xf32, #tpu.memory_space<vmem>>, vector<64x128xf32>,
    return
  }
  func.func @transform_0(%arg0: i32) -> (i32, i32) {
    %c0_i32 = arith.constant 0 : i32
    %c0_i32_0 = arith.constant 0 : i32
    return %arg0, %c0_i32 : i32, i32
  }
  func.func @transform_1(%arg0: i32) -> (i32, i32) {
    %c0_i32 = arith.constant 0 : i32
    %c0_i32_0 = arith.constant 0 : i32
    return %arg0, %c0_i32 : i32, i32
  }
  func.func @transform_2(%arg0: i32) -> (i32, i32) {
    %c0_i32 = arith.constant 0 : i32
    %c0_i32_0 = arith.constant 0 : i32
    %c0_i32_1 = arith.constant 0 : i32
    return %c0_i32, %c0_i32_0 : i32, i32
  }
  func.func @transform_3(%arg0: i32) -> (i32, i32) {
    %c0_i32 = arith.constant 0 : i32
    %c0_i32_0 = arith.constant 0 : i32
    %c0_i32_1 = arith.constant 0 : i32
    return %c0_i32, %c0_i32_0 : i32, i32
  }
  func.func @transform_4(%arg0: i32) -> (i32, i32) {
    %c0_i32 = arith.constant 0 : i32
    %c0_i32_0 = arith.constant 0 : i32
    %c0_i32_1 = arith.constant 0 : i32
    return %c0_i32, %c0_i32_0 : i32, i32
  }
  func.func @transform_5(%arg0: i32) -> (i32, i32) {
    %c0_i32 = arith.constant 0 : i32
    %c0_i32_0 = arith.constant 0 : i32
    %c0_i32_1 = arith.constant 0 : i32
    return %c0_i32, %c0_i32_0 : i32, i32
  }
  func.func @transform_6(%arg0: i32) -> (i32, i32) {
    %c0_i32 = arith.constant 0 : i32
    %c0_i32_0 = arith.constant 0 : i32
    %c0_i32_1 = arith.constant 0 : i32
    return %c0_i32, %c0_i32_0 : i32, i32
  }
  func.func @transform_7(%arg0: i32) -> (i32, i32) {
    %c0_i32 = arith.constant 0 : i32
    %c0_i32_0 = arith.constant 0 : i32
    %c0_i32_1 = arith.constant 0 : i32
    return %c0_i32, %c0_i32_0 : i32, i32
  }
  func.func @transform_8(%arg0: i32) -> (i32, i32) {
    %c0_i32 = arith.constant 0 : i32
    %c0_i32_0 = arith.constant 0 : i32
    return %arg0, %c0_i32 : i32, i32
  }
}

</mosaic_0001>

<bundles_post_ra>
// kernel: tile.14
= control target key start
LH: loop header
LB: loop body
LE: loop exit
PB: predicated region body
PF: predicated region fallthrough
CT: control target
= control target key end

     0   :  { %s37_s8 = smov 32   ;;  %s38_s9 = smov 64   ;;  %vm7_vm0 = vcmask 261120   ;;  %vm13_vm1 = vcmask 1048320   ;;  %vm19_vm2 = vcmask 785920   ;;  %vm25_vm3 = vcmask 523520   ;;  %s55_s0 = inlined_call_operand.vmem [shape: f32[4,32], index: 0, kind: input, shape index: {}]   ;;  %s56_s1 = inlined_call_operand.vmem [shape: f32[1,128], index: 1, kind: output, shape index: {}]  }
   0x1   :  { %v4_v0 = vld [vmem:[%s55_s0] sm:$0xf]  ;;  %s36_s0 = smov 96  }
   0x2   :  { %5 = vst [vmem:[#allocation1] sm:$0xf] %v4_v0 }
   0x9   :  { %v10_v1 = vld [vmem:[#allocation1 + $0x3] sm:$0x1]   ;;  %v22_v2 = vld [vmem:[#allocation1 + $0x1] sm:$0x1]   ;;  %v16_v3 = vld [vmem:[#allocation1 + $0x2] sm:$0x1]  }
   0xa   :  { %11 = vrot.lane.b32.xlu0 %v10_v1, %s36_s0  ;;  %23 = vrot.lane.b32.xlu1 %v22_v2, %s37_s8  ;;  %v6_v4 = vld [vmem:[#allocation1] sm:$0x1]  }
   0xb   :  { %8 = vst.msk [vmem:[#allocation0] sm:$0x1] %vm7_vm0, %v6_v4  }
  0x12   :  { %17 = vrot.lane.b32.xlu0 %v16_v3, %s38_s9 }
  0x7c   :  { %v12_v5 = vpop.permute.xlu0 %11   ;;  %v24_v6 = vpop.permute.xlu1 %23  }
  0x7d   :  { %14 = vst.msk [vmem:[#allocation0] sm:$0x1] %vm13_vm1, %v12_v5  }
  0x84   :  { %v18_v7 = vpop.permute.xlu0 %17  }
  0x85   :  { %20 = vst.msk [vmem:[#allocation0] sm:$0x1] %vm19_vm2, %v18_v7  }
  0x86   :  { %26 = vst.msk [vmem:[#allocation0] sm:$0x1] %vm25_vm3, %v24_v6  }
  0x8d   :  { %v29_v8 = vld [vmem:[#allocation0] sm:$0x1] }
  0x8e   :  { %32 = vst [vmem:[%s56_s1] sm:$0x1] %v29_v8 }

// kernel: eag_forward_pallas.1
= control target key start
LH: loop header
LB: loop body
LE: loop exit
PB: predicated region body
PF: predicated region fallthrough
CT: control target
= control target key end

     0   :  { %s1251_s27 = smov 0   ;;  %s1386_s0 = inlined_call_operand.vmem [shape: bf16[128,128], index: 0, kind: input, shape index: {}]   ;;  %s1387_s1 = inlined_call_operand.vmem [shape: bf16[128,128], index: 1, kind: input, shape index: {}]   ;;  %s1388_s2 = inlined_call_operand.vmem [shape: bf16[128,128], index: 2, kind: input, shape index: {}]   ;;  %s1389_s3 = inlined_call_operand.vmem [shape: bf16[128,128], index: 3, kind: input, shape index: {}]   ;;  %s1390_s4 = inlined_call_operand.vmem [shape: f32[1,128], index: 4, kind: input, shape index: {}]   ;;  %s1391_s5 = inlined_call_operand.vmem [shape: f32[1,128], index: 5, kind: input, shape index: {}]   ;;  %s1392_s6 = inlined_call_operand.vmem [shape: bf16[128,128], index: 6, kind: input, shape index: {}]   ;;  %s1393_s7 = inlined_call_operand.vmem [shape: f32[1,128], index: 7, kind: input, shape index: {}]   ;;  %s1394_s8 = inlined_call_operand.vmem [shape: f32[128,128], index: 8, kind: output, shape index: {}]  }
   0x1 LB: > { %s966_s28 = sadd.s32 4294967295, %s1204_s27   ;;  %p970_p0 = scmp.ge.s32.totalorder %s1204_s27, 1  ;;  %s1204_s27 = sphi %s1251_s27, %s18_s27  }
   0x2   : > { %p274_p1 = scmp.lt.s32.totalorder %s1204_s27, 3 }
   0x4   : > { %p275_p2 = pnand %p970_p0, %p274_p1 }
   0x5   : > { %s971_s23 = sshll.u32 (!%p275_p2), %s966_s28, 3 }
   0x6   : > { %278 = sbr.rel (%p275_p2) target bundleno = 409 (0x199), region = 52  ;;  %p314_p3 = scmp.lt.s32.totalorder (!%p275_p2), %s971_s23, 15 }
   0xb   : > { %v1130_v0 = vld [vmem:[%s1388_s2 + $0x38] sm:$0xff]  ;;  %v1129_v2 = vld [vmem:[%s1388_s2 + $0x30] sm:$0xff]  ;;  %v1128_v4 = vld [vmem:[%s1388_s2 + $0x28] sm:$0xff]  ;;  %s1396_s23 = smov (!%p314_p3, %s971_s23), 15 }
   0xc   : > { %v1138_v1 = vld [vmem:[%s1389_s3 + $0x38] sm:$0xff]  ;;  %439 = vmatpush.bf16.msra.mxu0 %v1130_v0  ;;  %v1137_v3 = vld [vmem:[%s1389_s3 + $0x30] sm:$0xff]  ;;  %1147 = vmatpush.bf16.msra.mxu3 %v1130_v0  ;;  %v1136_v5 = vld [vmem:[%s1389_s3 + $0x28] sm:$0xff]  ;;  %s972_s15 = sshll.u32 %s1396_s23, 2  ;;  %s976_s10 = sshll.u32 %s1396_s23, 3 }
   0xd   : > { %568 = vmatpush.bf16.msra.mxu1 %v1138_v1  ;;  %v1127_v6 = vld [vmem:[%s1388_s2 + $0x20] sm:$0xff]  ;;  %v1126_v8 = vld [vmem:[%s1388_s2 + $0x18] sm:$0xff]  ;;  %v1125_v10 = vld [vmem:[%s1388_s2 + $0x10] sm:$0xff]  ;;  %s317_s22 = scalar_lea.vmem %s1386_s0, %s972_s15  ;;  %s1316_s26 = scalar_lea.vmem %s1387_s1, %s972_s15 }
   0xe   : > { %v1135_v7 = vld [vmem:[%s1389_s3 + $0x20] sm:$0xff]  ;;  %v1134_v9 = vld [vmem:[%s1389_s3 + $0x18] sm:$0xff]  ;;  %v1133_v11 = vld [vmem:[%s1389_s3 + $0x10] sm:$0xff]  ;;  %s1366_s12 = scalar_lea.vmem %s1394_s8, %s976_s10 }
   0xf   : > { %v1124_v12 = vld [vmem:[%s1388_s2 + $0x8] sm:$0xff]  ;;  %v1123_v14 = vld [vmem:[%s1388_s2] sm:$0xff]  ;;  %v1117_v20 = vld [vmem:[%s317_s22 + $0x10] sm:$0xff] }
  0x10   : > { %440 = vmatpush.bf16.msra.mxu0 %v1129_v2  ;;  %1148 = vmatpush.bf16.msra.mxu3 %v1129_v2  ;;  %v1132_v13 = vld [vmem:[%s1389_s3 + $0x8] sm:$0xff]  ;;  %v1131_v15 = vld [vmem:[%s1389_s3] sm:$0xff]  ;;  %v1146_v21 = vld [vmem:[%s1392_s6 + $0x38] sm:$0xff] }
  0x11   : > { %569 = vmatpush.bf16.msra.mxu1 %v1137_v3  ;;  %v1115_v16 = vld [vmem:[%s317_s22] sm:$0xff]  ;;  %v1116_v18 = vld [vmem:[%s317_s22 + $0x8] sm:$0xff]  ;;  %685 = vmatpush.bf16.msra.mxu2 %v1146_v21  ;;  %v1145_v22 = vld [vmem:[%s1392_s6 + $0x30] sm:$0xff] }
  0x12   : > { %v1119_v17 = vld [vmem:[%s1316_s26] sm:$0xff]  ;;  %v1120_v19 = vld [vmem:[%s1316_s26 + $0x8] sm:$0xff]  ;;  %v1121_v25 = vld [vmem:[%s1316_s26 + $0x10] sm:$0xff] }
  0x13   : > { %v1144_v23 = vld [vmem:[%s1392_s6 + $0x28] sm:$0xff]  ;;  %v1143_v24 = vld [vmem:[%s1392_s6 + $0x20] sm:$0xff]  ;;  %v1118_v26 = vld [vmem:[%s317_s22 + $0x18] sm:$0xff] }
  0x14   : > { %441 = vmatpush.bf16.msra.mxu0 %v1128_v4  ;;  %1149 = vmatpush.bf16.msra.mxu3 %v1128_v4  ;;  %v1122_v27 = vld [vmem:[%s1316_s26 + $0x18] sm:$0xff]  ;;  %v1141_v29 = vld [vmem:[%s1392_s6 + $0x10] sm:$0xff]  ;;  %v1140_v30 = vld [vmem:[%s1392_s6 + $0x8] sm:$0xff] }
  0x15   : > { %570 = vmatpush.bf16.msra.mxu1 %v1136_v5  ;;  %686 = vmatpush.bf16.msra.mxu2 %v1145_v22  ;;  %v1142_v28 = vld [vmem:[%s1392_s6 + $0x18] sm:$0xff]  ;;  %v1139_v31 = vld [vmem:[%s1392_s6] sm:$0xff] }
  0x16   : > { %v1163_v34 = vld [vmem:[%s1390_s4] ss:$0 sm:$0xff] }
  0x17   : > { %v1164_v35 = vld [vmem:[%s1391_s5] ss:$0 sm:$0xff] }
  0x18   : > { %442 = vmatpush.bf16.msra.mxu0 %v1127_v6  ;;  %1150 = vmatpush.bf16.msra.mxu3 %v1127_v6 }
  0x19   : > { %571 = vmatpush.bf16.msra.mxu1 %v1135_v7  ;;  %687 = vmatpush.bf16.msra.mxu2 %v1144_v23 }
  0x1c   : > { %443 = vmatpush.bf16.msra.mxu0 %v1126_v8  ;;  %1151 = vmatpush.bf16.msra.mxu3 %v1126_v8 }
  0x1d   : > { %572 = vmatpush.bf16.msra.mxu1 %v1134_v9  ;;  %688 = vmatpush.bf16.msra.mxu2 %v1143_v24 }
  0x20   : > { %444 = vmatpush.bf16.msra.mxu0 %v1125_v10  ;;  %1152 = vmatpush.bf16.msra.mxu3 %v1125_v10 }
  0x21   : > { %573 = vmatpush.bf16.msra.mxu1 %v1133_v11  ;;  %689 = vmatpush.bf16.msra.mxu2 %v1142_v28 }
  0x24   : > { %445 = vmatpush.bf16.msra.mxu0 %v1124_v12  ;;  %1153 = vmatpush.bf16.msra.mxu3 %v1124_v12 }
  0x25   : > { %574 = vmatpush.bf16.msra.mxu1 %v1132_v13  ;;  %690 = vmatpush.bf16.msra.mxu2 %v1141_v29 }
  0x28   : > { %446 = vmatpush.bf16.msra.mxu0 %v1123_v14  ;;  %1154 = vmatpush.bf16.msra.mxu3 %v1123_v14 }
  0x29   : > { %575 = vmatpush.bf16.msra.mxu1 %v1131_v15  ;;  %691 = vmatpush.bf16.msra.mxu2 %v1140_v30  ;;  %v1355_v30 = vld [vmem:[%s1393_s7] ss:$0 sm:$0xff] }
  0x2b   : > { %447 = vmatmul.bf16.vlgmr.msra.gmra.mxu0 %v1115_v16  ;;  %452 = vmatmul.bf16.vlgmr.msra.gmra.mxu3 %v1116_v18 }
  0x2c   : > { %576 = vmatmul.bf16.vlgmr.msra.gmra.mxu1 %v1119_v17 }
  0x2d   : > { %692 = vmatpush.bf16.msra.mxu2 %v1139_v31 }
  0x3b   : > { %457 = vmatmul.bf16.gmra.mxu3 %v1117_v20 }
  0x3c   : > { %581 = vmatmul.bf16.gmra.mxu1 %v1120_v19 }
  0x4b   : > { %462 = vmatmul.bf16.gmra.mxu3 %v1118_v26 }
  0x4c   : > { %586 = vmatmul.bf16.gmra.mxu1 %v1121_v25 }
  0x5c   : > { %591 = vmatmul.bf16.gmra.mxu1 %v1122_v27 }
  0xa8   : > { %v448_v32 = vpop.f32.mrf.mxu0 }
  0xa9   : > { %v577_v33 = vpop.f32.mrf.mxu1  ;;  %v449_v36 = vadd.f32 %v1163_v34, %v448_v32 }
  0xaa   : > { %v578_v37 = vadd.f32 %v1164_v35, %v577_v33 }
  0xab   : > { %v468_v41 = vmax.f32 %v449_v36, 0.0 }
  0xac   : > { %v597_v42 = vmax.f32 %v578_v37, 0.0 }
  0xae   : > { %v453_v38 = vpop.f32.mrf.mxu3  ;;  %v605_v47 = vadd.f32 %v597_v42, %v468_v41 }
  0xaf   : > { %v454_v52 = vadd.f32 %v1163_v34, %v453_v38 }
  0xb0   : > { %v450_v39 = vpop.f32.mrf.mxu0 }
  0xb1   : > { %v579_v40 = vpop.f32.mrf.mxu1  ;;  %v451_v43 = vadd.f32 %v1163_v34, %v450_v39  ;;  %v470_v57 = vmax.f32 %v454_v52, 0.0 }
  0xb2   : > { %v580_v44 = vadd.f32 %v1164_v35, %v579_v40 }
  0xb3   : > { %v469_v45 = vmax.f32 %v451_v43, 0.0 }
  0xb4   : > { %v598_v46 = vmax.f32 %v580_v44, 0.0 }
  0xb6   : > { %v606_v48 = vadd.f32 %v598_v46, %v469_v45  ;;  %v455_v49 = vpop.f32.mrf.mxu3 }
  0xb7   : > { %v456_v54 = vadd.f32 %v1163_v34, %v455_v49  ;;  %v339_v49 = vld [vmem:[%s1316_s26] sm:$0xff]  }
  0xb8   : > { %v613_v50 = vpack.c.bf16 %v606_v48, %v605_v47 }
  0xb9   : > { %v582_v51 = vpop.f32.mrf.mxu1  ;;  %v471_v60 = vmax.f32 %v456_v54, 0.0 }
  0xba   : > { %693 = vmatmul.bf16.vlgmr.msra.gmra.mxu2 %v613_v50  ;;  %v583_v53 = vadd.f32 %v1164_v35, %v582_v51 }
  0xbc   : > { %v599_v58 = vmax.f32 %v583_v53, 0.0 }
  0xbe   : > { %v458_v55 = vpop.f32.mrf.mxu3  ;;  %v607_v62 = vadd.f32 %v599_v58, %v470_v57  ;;  %v866_v58 = vunpack.c.l.bf16 %v339_v49 }
  0xbf   : > { %v459_v3 = vadd.f32 %v1163_v34, %v458_v55 }
  0xc1   : > { %v584_v56 = vpop.f32.mrf.mxu1  ;;  %v472_v7 = vmax.f32 %v459_v3, 0.0 }
  0xc2   : > { %v585_v59 = vadd.f32 %v1164_v35, %v584_v56 }
  0xc4   : > { %v600_v61 = vmax.f32 %v585_v59, 0.0 }
  0xc6   : > { %v608_v63 = vadd.f32 %v600_v61, %v471_v60  ;;  %v460_v1 = vpop.f32.mrf.mxu3 }
  0xc7   : > { %v461_v5 = vadd.f32 %v1163_v34, %v460_v1 }
  0xc8   : > { %v614_v0 = vpack.c.bf16 %v608_v63, %v607_v62 }
  0xc9   : > { %v587_v2 = vpop.f32.mrf.mxu1  ;;  %v473_v11 = vmax.f32 %v461_v5, 0.0 }
  0xca   : > { %698 = vmatmul.bf16.gmra.mxu2 %v614_v0  ;;  %v588_v4 = vadd.f32 %v1164_v35, %v587_v2 }
  0xcc   : > { %v601_v8 = vmax.f32 %v588_v4, 0.0 }
  0xce   : > { %v463_v10 = vpop.f32.mrf.mxu3  ;;  %v609_v13 = vadd.f32 %v601_v8, %v472_v7 }
  0xcf   : > { %v464_v18 = vadd.f32 %v1163_v34, %v463_v10 }
  0xd1   : > { %v589_v6 = vpop.f32.mrf.mxu1  ;;  %v474_v22 = vmax.f32 %v464_v18, 0.0 }
  0xd2   : > { %v590_v9 = vadd.f32 %v1164_v35, %v589_v6 }
  0xd4   : > { %v602_v12 = vmax.f32 %v590_v9, 0.0 }
  0xd6   : > { %v610_v14 = vadd.f32 %v602_v12, %v473_v11  ;;  %v465_v17 = vpop.f32.mrf.mxu3  ;;  %v867_v12 = vunpack.c.h.bf16 %v339_v49 }
  0xd7   : > { %v466_v20 = vadd.f32 %v1163_v34, %v465_v17 }
  0xd8   : > { %v615_v15 = vpack.c.bf16 %v610_v14, %v609_v13 }
  0xd9   : > { %v592_v16 = vpop.f32.mrf.mxu1  ;;  %v475_v25 = vmax.f32 %v466_v20, 0.0 }
  0xda   : > { %703 = vmatmul.bf16.gmra.mxu2 %v615_v15  ;;  %v593_v19 = vadd.f32 %v1164_v35, %v592_v16 }
  0xdc   : > { %v603_v23 = vmax.f32 %v593_v19, 0.0 }
  0xde   : > { %v611_v27 = vadd.f32 %v603_v23, %v474_v22  ;;  %v341_v23 = vld [vmem:[%s1316_s26 + $0x8] sm:$0xff]  }
  0xe1   : > { %v594_v21 = vpop.f32.mrf.mxu1 }
  0xe2   : > { %v595_v24 = vadd.f32 %v1164_v35, %v594_v21 }
  0xe4   : > { %v604_v26 = vmax.f32 %v595_v24, 0.0 }
  0xe6   : > { %v612_v28 = vadd.f32 %v604_v26, %v475_v25 }
  0xe8   : > { %v616_v29 = vpack.c.bf16 %v612_v28, %v611_v27 }
  0xea   : > { %708 = vmatmul.bf16.gmra.mxu2 %v616_v29 }
 0x13d   : > { %v694_v31 = vpop.f32.mrf.mxu2 }
 0x13e   : > { %v695_v32 = vadd.f32 %v1355_v30, %v694_v31 }
 0x140   : > { %v1105_v33 = vmul.f32 -1.442695, %v695_v32  ;;  %v868_v32 = vunpack.c.l.bf16 %v341_v23 }
 0x142   : > { %1166 = vpow2.f32 %v1105_v33 }
 0x145   : > { %v696_v34 = vpop.f32.mrf.mxu2 }
 0x146   : > { %v697_v36 = vadd.f32 %v1355_v30, %v696_v34 }
 0x148   : > { %v1167_v35 = vpop.eup %1166  ;;  %v1106_v37 = vmul.f32 -1.442695, %v697_v36 }
 0x149   : > { %v738_v38 = vadd.f32 1.0, %v1167_v35 }
 0x14a   : > { %1168 = vpow2.f32 %v1106_v37 }
 0x14b   : > { %1170 = vrcp.f32 %v738_v38  ;;  %v757_v47 = vand.u32 2147483648, %v738_v38  ;;  %v755_v51 = vand.u32 2147483647, %v738_v38  ;;  %vm751_vm1 = vweird.f32 %v738_v38 }
 0x14d   : > { %v699_v39 = vpop.f32.mrf.mxu2  ;;  %v758_v57 = vor.u32 1.1754944e-38, %v757_v47  ;;  %vm756_vm3 = vcmp.eq.f32.partialorder %v755_v51, 8.507059e+37 }
 0x14e   : > { %v700_v40 = vadd.f32 %v1355_v30, %v699_v39 }
 0x150   : > { %v1169_v41 = vpop.eup %1168  ;;  %v1107_v42 = vmul.f32 -1.442695, %v700_v40 }
 0x151   : > { %v1171_v43 = vpop.eup %1170  ;;  %v739_v44 = vadd.f32 1.0, %v1169_v41 }
 0x152   : > { %v747_v45 = vmul.f32 %v1171_v43, %v738_v38  ;;  %1172 = vpow2.f32 %v1107_v42  ;;  %vm752_vm0 = vweird.f32 %v1171_v43 }
 0x153   : > { %1174 = vrcp.f32 %v739_v44  ;;  %vm753_vm2 = vmor %vm751_vm1, %vm752_vm0  ;;  %v770_v1 = vand.u32 2147483647, %v739_v44  ;;  %v772_v2 = vand.u32 2147483648, %v739_v44  ;;  %vm766_vm5 = vweird.f32 %v739_v44 }
 0x154   : > { %v748_v46 = vsub.f32 1.0, %v747_v45 }
 0x155   : > { %v701_v48 = vpop.f32.mrf.mxu2  ;;  %v773_v11 = vor.u32 1.1754944e-38, %v772_v2  ;;  %vm771_vm7 = vcmp.eq.f32.partialorder %v770_v1, 8.507059e+37 }
 0x156   : > { %v749_v50 = vmul.f32 %v1171_v43, %v748_v46  ;;  %v702_v52 = vadd.f32 %v1355_v30, %v701_v48 }
 0x158   : > { %v1173_v53 = vpop.eup %1172  ;;  %v750_v54 = vadd.f32 %v1171_v43, %v749_v50  ;;  %v1108_v55 = vmul.f32 -1.442695, %v702_v52  ;;  %v869_v50 = vunpack.c.h.bf16 %v341_v23 }
 0x159   : > { %v1175_v56 = vpop.eup %1174  ;;  %v740_v59 = vadd.f32 1.0, %v1173_v53 }
 0x15a   : > { %v754_v60 = vsel %vm753_vm2, %v1171_v43, %v750_v54  ;;  %v762_v61 = vmul.f32 %v1175_v56, %v739_v44  ;;  %1176 = vpow2.f32 %v1108_v55  ;;  %vm767_vm4 = vweird.f32 %v1175_v56 }
 0x15b   : > { %v759_v62 = vsel %vm756_vm3, %v758_v57, %v754_v60  ;;  %1178 = vrcp.f32 %v740_v59  ;;  %vm768_vm6 = vmor %vm766_vm5, %vm767_vm4  ;;  %v785_v19 = vand.u32 2147483647, %v740_v59  ;;  %v787_v20 = vand.u32 2147483648, %v740_v59 }
 0x15c   : > { %v874_v63 = vadd.f32 1.0, %v759_v62  ;;  %v763_v0 = vsub.f32 1.0, %v762_v61  ;;  %vm781_vm9 = vweird.f32 %v740_v59  ;;  %v343_v61 = vld [vmem:[%s1316_s26 + $0x10] sm:$0xff]  }
 0x15d   : > { %v704_v3 = vpop.f32.mrf.mxu2  ;;  %v788_v31 = vor.u32 1.1754944e-38, %v787_v20  ;;  %vm786_vm11 = vcmp.eq.f32.partialorder %v785_v19, 8.507059e+37 }
 0x15e   : > { %v882_v4 = vmul.f32 %v874_v63, %v866_v58  ;;  %v764_v5 = vmul.f32 %v1175_v56, %v763_v0  ;;  %v705_v6 = vadd.f32 %v1355_v30, %v704_v3 }
 0x160   : > { %v1177_v7 = vpop.eup %1176  ;;  %890 = vst [vmem:[%s1366_s12] sm:$0xff] %v882_v4  ;;  %v765_v8 = vadd.f32 %v1175_v56, %v764_v5  ;;  %v1109_v9 = vmul.f32 -1.442695, %v705_v6  ;;  %v870_v5 = vunpack.c.l.bf16 %v343_v61 }
 0x161   : > { %v1179_v10 = vpop.eup %1178  ;;  %v741_v13 = vadd.f32 1.0, %v1177_v7 }
 0x162   : > { %v769_v14 = vsel %vm768_vm6, %v1175_v56, %v765_v8  ;;  %v777_v15 = vmul.f32 %v1179_v10, %v740_v59  ;;  %1180 = vpow2.f32 %v1109_v9  ;;  %vm782_vm8 = vweird.f32 %v1179_v10 }
 0x163   : > { %v774_v16 = vsel %vm771_vm7, %v773_v11, %v769_v14  ;;  %1182 = vrcp.f32 %v741_v13  ;;  %vm783_vm10 = vmor %vm781_vm9, %vm782_vm8  ;;  %v800_v39 = vand.u32 2147483647, %v741_v13  ;;  %v802_v40 = vand.u32 2147483648, %v741_v13 }
 0x164   : > { %v875_v17 = vadd.f32 1.0, %v774_v16  ;;  %v778_v18 = vsub.f32 1.0, %v777_v15  ;;  %vm796_vm13 = vweird.f32 %v741_v13 }
 0x165   : > { %v706_v21 = vpop.f32.mrf.mxu2  ;;  %v803_v49 = vor.u32 1.1754944e-38, %v802_v40  ;;  %vm801_vm15 = vcmp.eq.f32.partialorder %v800_v39, 8.507059e+37 }
 0x166   : > { %v883_v22 = vmul.f32 %v875_v17, %v867_v12  ;;  %v779_v24 = vmul.f32 %v1179_v10, %v778_v18  ;;  %v707_v25 = vadd.f32 %v1355_v30, %v706_v21  ;;  %v871_v21 = vunpack.c.h.bf16 %v343_v61 }
 0x168   : > { %v1181_v26 = vpop.eup %1180  ;;  %891 = vst [vmem:[%s1366_s12 + $0x8] sm:$0xff] %v883_v22  ;;  %v780_v27 = vadd.f32 %v1179_v10, %v779_v24  ;;  %v1110_v28 = vmul.f32 -1.442695, %v707_v25 }
 0x169   : > { %v1183_v29 = vpop.eup %1182  ;;  %v742_v33 = vadd.f32 1.0, %v1181_v26 }
 0x16a   : > { %v784_v34 = vsel %vm783_vm10, %v1179_v10, %v780_v27  ;;  %v792_v36 = vmul.f32 %v1183_v29, %v741_v13  ;;  %1184 = vpow2.f32 %v1110_v28  ;;  %vm797_vm12 = vweird.f32 %v1183_v29 }
 0x16b   : > { %v789_v35 = vsel %vm786_vm11, %v788_v31, %v784_v34  ;;  %1186 = vrcp.f32 %v742_v33  ;;  %vm798_vm14 = vmor %vm796_vm13, %vm797_vm12  ;;  %v815_v57 = vand.u32 2147483647, %v742_v33  ;;  %v817_v58 = vand.u32 2147483648, %v742_v33  ;;  %v345_v31 = vld [vmem:[%s1316_s26 + $0x18] sm:$0xff]  }
 0x16c   : > { %v876_v37 = vadd.f32 1.0, %v789_v35  ;;  %v793_v38 = vsub.f32 1.0, %v792_v36  ;;  %vm811_vm1 = vweird.f32 %v742_v33  ;;  %v872_v35 = vunpack.c.l.bf16 %v345_v31 }
 0x16d   : > { %v709_v41 = vpop.f32.mrf.mxu2  ;;  %v818_v4 = vor.u32 1.1754944e-38, %v817_v58  ;;  %vm816_vm3 = vcmp.eq.f32.partialorder %v815_v57, 8.507059e+37 }
 0x16e   : > { %v884_v42 = vmul.f32 %v876_v37, %v868_v32  ;;  %v794_v43 = vmul.f32 %v1183_v29, %v793_v38  ;;  %v710_v44 = vadd.f32 %v1355_v30, %v709_v41 }
 0x170   : > { %v1185_v45 = vpop.eup %1184  ;;  %892 = vst [vmem:[%s1366_s12 + $0x10] sm:$0xff] %v884_v42  ;;  %v795_v46 = vadd.f32 %v1183_v29, %v794_v43  ;;  %v1111_v47 = vmul.f32 -1.442695, %v710_v44 }
 0x171   : > { %v1187_v48 = vpop.eup %1186  ;;  %v743_v51 = vadd.f32 1.0, %v1185_v45 }
 0x172   : > { %v799_v52 = vsel %vm798_vm14, %v1183_v29, %v795_v46  ;;  %v807_v53 = vmul.f32 %v1187_v48, %v742_v33  ;;  %1188 = vpow2.f32 %v1111_v47  ;;  %vm812_vm0 = vweird.f32 %v1187_v48 }
 0x173   : > { %v804_v54 = vsel %vm801_vm15, %v803_v49, %v799_v52  ;;  %1190 = vrcp.f32 %v743_v51  ;;  %vm813_vm2 = vmor %vm811_vm1, %vm812_vm0  ;;  %v830_v14 = vand.u32 2147483647, %v743_v51  ;;  %vm826_vm5 = vweird.f32 %v743_v51 }
 0x174   : > { %v877_v55 = vadd.f32 1.0, %v804_v54  ;;  %v808_v56 = vsub.f32 1.0, %v807_v53 }
 0x175   : > { %v711_v59 = vpop.f32.mrf.mxu2  ;;  %vm831_vm7 = vcmp.eq.f32.partialorder %v830_v14, 8.507059e+37 }
 0x176   : > { %v885_v60 = vmul.f32 %v877_v55, %v869_v50  ;;  %v809_v62 = vmul.f32 %v1187_v48, %v808_v56  ;;  %v712_v63 = vadd.f32 %v1355_v30, %v711_v59  ;;  %v832_v30 = vand.u32 2147483648, %v743_v51 }
 0x178   : > { %v1189_v0 = vpop.eup %1188  ;;  %893 = vst [vmem:[%s1366_s12 + $0x18] sm:$0xff] %v885_v60  ;;  %v810_v1 = vadd.f32 %v1187_v48, %v809_v62  ;;  %v1112_v2 = vmul.f32 -1.442695, %v712_v63  ;;  %v833_v18 = vor.u32 1.1754944e-38, %v832_v30 }
 0x179   : > { %v1191_v3 = vpop.eup %1190  ;;  %v744_v6 = vadd.f32 1.0, %v1189_v0 }
 0x17a   : > { %v814_v7 = vsel %vm813_vm2, %v1187_v48, %v810_v1  ;;  %v822_v8 = vmul.f32 %v1191_v3, %v743_v51  ;;  %1192 = vpow2.f32 %v1112_v2  ;;  %vm827_vm4 = vweird.f32 %v1191_v3 }
 0x17b   : > { %v819_v9 = vsel %vm816_vm3, %v818_v4, %v814_v7  ;;  %1194 = vrcp.f32 %v744_v6  ;;  %vm828_vm6 = vmor %vm826_vm5, %vm827_vm4  ;;  %v847_v26 = vand.u32 2147483648, %v744_v6  ;;  %v845_v29 = vand.u32 2147483647, %v744_v6 }
 0x17c   : > { %v878_v10 = vadd.f32 1.0, %v819_v9  ;;  %v823_v11 = vsub.f32 1.0, %v822_v8  ;;  %vm841_vm9 = vweird.f32 %v744_v6  ;;  %v873_v48 = vunpack.c.h.bf16 %v345_v31 }
 0x17d   : > { %v848_v34 = vor.u32 1.1754944e-38, %v847_v26  ;;  %vm846_vm11 = vcmp.eq.f32.partialorder %v845_v29, 8.507059e+37 }
 0x17e   : > { %v886_v12 = vmul.f32 %v878_v10, %v870_v5  ;;  %v824_v13 = vmul.f32 %v1191_v3, %v823_v11 }
 0x180   : > { %v1193_v15 = vpop.eup %1192  ;;  %894 = vst [vmem:[%s1366_s12 + $0x20] sm:$0xff] %v886_v12  ;;  %v825_v16 = vadd.f32 %v1191_v3, %v824_v13 }
 0x181   : > { %v1195_v17 = vpop.eup %1194  ;;  %v745_v19 = vadd.f32 1.0, %v1193_v15 }
 0x182   : > { %v829_v20 = vsel %vm828_vm6, %v1191_v3, %v825_v16  ;;  %v837_v22 = vmul.f32 %v1195_v17, %v744_v6  ;;  %vm842_vm8 = vweird.f32 %v1195_v17 }
 0x183   : > { %v834_v23 = vsel %vm831_vm7, %v833_v18, %v829_v20  ;;  %1196 = vrcp.f32 %v745_v19  ;;  %vm843_vm10 = vmor %vm841_vm9, %vm842_vm8  ;;  %v862_v41 = vand.u32 2147483648, %v745_v19  ;;  %v860_v44 = vand.u32 2147483647, %v745_v19 }
 0x184   : > { %v879_v24 = vadd.f32 1.0, %v834_v23  ;;  %v838_v25 = vsub.f32 1.0, %v837_v22  ;;  %vm856_vm13 = vweird.f32 %v745_v19 }
 0x185   : > { %v863_v46 = vor.u32 1.1754944e-38, %v862_v41  ;;  %vm861_vm15 = vcmp.eq.f32.partialorder %v860_v44, 8.507059e+37 }
 0x186   : > { %v887_v27 = vmul.f32 %v879_v24, %v871_v21  ;;  %v839_v28 = vmul.f32 %v1195_v17, %v838_v25 }
 0x188   : > { %895 = vst [vmem:[%s1366_s12 + $0x28] sm:$0xff] %v887_v27  ;;  %v840_v32 = vadd.f32 %v1195_v17, %v839_v28 }
 0x189   : > { %v1197_v33 = vpop.eup %1196 }
 0x18a   : > { %v844_v36 = vsel %vm843_vm10, %v1195_v17, %v840_v32  ;;  %v852_v37 = vmul.f32 %v1197_v33, %v745_v19  ;;  %vm857_vm12 = vweird.f32 %v1197_v33 }
 0x18b   : > { %v849_v38 = vsel %vm846_vm11, %v848_v34, %v844_v36  ;;  %vm858_vm14 = vmor %vm856_vm13, %vm857_vm12 }
 0x18c   : > { %v880_v39 = vadd.f32 1.0, %v849_v38  ;;  %v853_v40 = vsub.f32 1.0, %v852_v37 }
 0x18e   : > { %v888_v42 = vmul.f32 %v880_v39, %v872_v35  ;;  %v854_v43 = vmul.f32 %v1197_v33, %v853_v40 }
 0x190   : > { %896 = vst [vmem:[%s1366_s12 + $0x30] sm:$0xff] %v888_v42  ;;  %v855_v45 = vadd.f32 %v1197_v33, %v854_v43 }
 0x192   : > { %v859_v47 = vsel %vm858_vm14, %v1197_v33, %v855_v45 }
 0x193   : > { %v864_v49 = vsel %vm861_vm15, %v863_v46, %v859_v47 }
 0x194   : > { %v881_v50 = vadd.f32 1.0, %v864_v49 }
 0x196   : > { %v889_v51 = vmul.f32 %v881_v50, %v873_v48 }
 0x198   : > { %897 = vst [vmem:[%s1366_s12 + $0x38] sm:$0xff] %v889_v51 }
 0x199 PF: > { %s18_s27 = sadd.s32 1, %s1204_s27  }
 0x19a   : > { %p15_p4 = scmp.ge.s32.totalorder %s18_s27, 4  }
 0x19c   :  { %17 = sbr.rel (!%p15_p4) target bundleno = 1 (0x1), region = 85 }

</bundles_post_ra>
